<compile_context>
chip_gen: v5e
topology: v5e:2x2
jax: 0.10.0
libtpu: 0.0.40
codegen_flags: <defaults>
</compile_context>

<pallas_src>
import functools

import jax
import jax.numpy as jnp
from jax.experimental import pallas as pl
from jax.experimental.pallas import tpu as pltpu


def _round_up(x, m):
    return (x + m - 1) // m * m


def _head_kernel(h1_ref, h2_ref, w1a_ref, w1b_ref, w1c_ref, b1_ref,
                 w2_ref, b2_ref, out_ref, acc1_ref, acc2_ref, *, pool):
    # Grid = (batch_tiles, h_chunks).
    # h1_ref, h2_ref: (TB, L, Hc) streamed bf16 chunks of the hidden states.
    # acc1/acc2:      (TB, L) f32 scratch (running sum for mean / running max).
    # w1a/w1b/w1c:    (L, D_mid) row-blocks of W1 (pre-transposed, mean-scaled).
    # b1: (1, D_mid)  w2: (D_mid, N_pad)  b2: (1, N_pad)  out_ref: (TB, N_pad)
    j = pl.program_id(1)

    @pl.when(j == 0)
    def _():
        if pool == "max":
            acc1_ref[...] = jnp.full_like(acc1_ref, -jnp.inf)
            acc2_ref[...] = jnp.full_like(acc2_ref, -jnp.inf)
        else:
            acc1_ref[...] = jnp.zeros_like(acc1_ref)
            acc2_ref[...] = jnp.zeros_like(acc2_ref)

    if pool == "max":
        # Reduce directly on the streamed bf16 tile (exact for max); only the
        # small (TB, L) result is cast to f32 -- no full-tile f32 copy in VMEM.
        acc1_ref[...] = jnp.maximum(
            acc1_ref[...], jnp.max(h1_ref[...], axis=2).astype(jnp.float32))
        acc2_ref[...] = jnp.maximum(
            acc2_ref[...], jnp.max(h2_ref[...], axis=2).astype(jnp.float32))
    else:
        # f32-accumulating sum fused with the bf16 load; the 1/H mean scale is
        # folded into W1a/W1b/W1c on the host, so raw sums are correct here.
        acc1_ref[...] += jnp.sum(h1_ref[...], axis=2, dtype=jnp.float32)
        acc2_ref[...] += jnp.sum(h2_ref[...], axis=2, dtype=jnp.float32)

    @pl.when(j == pl.num_programs(1) - 1)
    def _():
        e1 = acc1_ref[...]                           # (TB, L) f32
        e2 = acc2_ref[...]
        d = jnp.abs(e1 - e2)
        # concat([e1, e2, d], axis=1) @ W1  ==  e1@W1a + e2@W1b + d@W1c
        z = (jnp.dot(e1, w1a_ref[...], preferred_element_type=jnp.float32)
             + jnp.dot(e2, w1b_ref[...], preferred_element_type=jnp.float32)
             + jnp.dot(d, w1c_ref[...], preferred_element_type=jnp.float32)
             + b1_ref[...])                          # (TB, D_mid)
        hmid = jnp.maximum(z, 0.0)                   # ReLU
        out_ref[...] = (jnp.dot(hmid, w2_ref[...],
                                preferred_element_type=jnp.float32)
                        + b2_ref[...]).astype(out_ref.dtype)


def _vmem_budget():
    """Per-generation (per-input tile target bytes, scoped vmem limit bytes)."""
    try:
        info = pltpu.get_tpu_info()
        vmem_cap = int(getattr(info, "vmem_capacity_bytes", 64 * 1024 * 1024))
    except Exception:
        vmem_cap = 64 * 1024 * 1024        # conservative default (v7x-sized)
    if vmem_cap >= 100 * 1024 * 1024:
        # v5e / v6e: 128 MiB physical VMEM -> bigger tiles amortize the
        # ~0.35 us per-grid-step overhead and keep DMAs long.
        return 12 * 1024 * 1024, 96 * 1024 * 1024
    # v7x: 64 MiB physical VMEM per TensorCore.
    return 8 * 1024 * 1024, 48 * 1024 * 1024


def _pick_h_chunk(H, L, itemsize, target_tile_bytes):
    """Largest H chunk (full H, or a 128-multiple divisor of H) whose 8-row
    tile fits the per-input target, so large L*H never blows the VMEM limit."""
    if 8 * L * H * itemsize <= target_tile_bytes or H % 128 != 0:
        return H
    best = 128
    c = 256
    while c < H:
        if H % c == 0 and 8 * L * c * itemsize <= target_tile_bytes:
            best = c
        c += 128
    return best


def bert_classifier_head(h1, h2, w1_t, b1, w2_t, b2, *, pool="mean",
                         stream_dtype=jnp.bfloat16, batch_tile=None,
                         target_tile_bytes=None, vmem_limit_bytes=None):
    """h1, h2: (B, L, H) hidden states; Linear weights pre-transposed to (in, out)."""
    assert pool in ("mean", "max")
    B, L, H = h1.shape
    d_in = 3 * L
    assert w1_t.shape[0] == d_in
    d_mid = w1_t.shape[1]
    num_labels = w2_t.shape[1]

    auto_target, auto_limit = _vmem_budget()
    if target_tile_bytes is None:
        target_tile_bytes = auto_target
    if vmem_limit_bytes is None:
        vmem_limit_bytes = auto_limit

    # Stream the hidden states at reduced precision (the kernel is HBM-read
    # bound on h1/h2); all reductions accumulate in f32 inside the kernel.
    h1s = h1.astype(stream_dtype)
    h2s = h2.astype(stream_dtype)
    itemsize = jnp.dtype(stream_dtype).itemsize

    # Split the H reduction axis when a single 8-row tile would exceed the
    # per-input budget (decouples tile bytes from L*H).
    h_chunk = _pick_h_chunk(H, L, itemsize, target_tile_bytes)
    n_h = H // h_chunk

    # Batch tile: multiple of 8 sublanes, targeting ~target_tile_bytes per
    # input so 2 inputs x 2 pipeline buffers fit scoped VMEM everywhere.
    if batch_tile is None:
        row_bytes = max(L * h_chunk * itemsize, 1)
        cap = max(8, (target_tile_bytes // row_bytes) // 8 * 8)
        batch_tile = min(_round_up(B, 8), cap)
        # Guarantee >= 2 batch tiles when possible so both v7x TensorCores get
        # grid steps under dimension_semantics=("parallel", ...).
        b8 = _round_up(B, 8)
        if batch_tile >= b8 and b8 >= 16:
            batch_tile = max(8, (b8 // 2) // 8 * 8)
    assert batch_tile % 8 == 0

    # Pad batch to a multiple of the tile; padded rows are sliced off after.
    B_pad = _round_up(B, batch_tile)
    if B_pad != B:
        pad = ((0, B_pad - B), (0, 0), (0, 0))
        h1s = jnp.pad(h1s, pad)
        h2s = jnp.pad(h2s, pad)
    n_tiles = B_pad // batch_tile

    # Pre-split W1 on the host (fuses the concat algebraically, no in-kernel
    # slicing at non-8-aligned sublane offsets).  For mean pooling the 1/H
    # scale is folded into W1 so the kernel accumulates raw sums.
    scale = (1.0 / H) if pool == "mean" else 1.0
    w1a = w1_t[0:L, :] * scale
    w1b = w1_t[L:2 * L, :] * scale
    w1c = w1_t[2 * L:3 * L, :] * scale
    b1r = b1.reshape(1, -1)

    # Lane-dense output: pad the label dim to 128 (zero-padded W2 columns and
    # bias) so the final store is full-width; sliced back on the host.
    n_out = max(128, _round_up(num_labels, 128))
    w2p = jnp.zeros((d_mid, n_out), w2_t.dtype).at[:, :num_labels].set(w2_t)
    b2p = jnp.zeros((1, n_out), b2.dtype).at[:, :num_labels].set(b2.reshape(1, -1))

    kernel = functools.partial(_head_kernel, pool=pool)

    weight_bytes = (3 * L * d_mid + d_mid + d_mid * n_out + n_out) * 4
    cost = pl.CostEstimate(
        flops=int(2 * B_pad * L * H                       # two pooling reductions
                  + 2 * B_pad * (d_in * d_mid + d_mid * n_out)),
        transcendentals=0,
        bytes_accessed=int(2 * B_pad * L * H * itemsize
                           + weight_bytes
                           + B_pad * n_out * 4))

    def _run(single_buffer_weights):
        if single_buffer_weights:
            # Constant operands: index_map never changes, so one buffer is
            # enough -- reclaims VMEM for larger streamed h1/h2 tiles.
            def w_spec(shape):
                return pl.BlockSpec(shape, lambda i, j: (0, 0),
                                    pipeline_mode=pl.Buffered(1))
        else:
            def w_spec(shape):
                return pl.BlockSpec(shape, lambda i, j: (0, 0))

        return pl.pallas_call(
            kernel,
            out_shape=jax.ShapeDtypeStruct((B_pad, n_out), jnp.float32),
            grid=(n_tiles, n_h),
            in_specs=[
                pl.BlockSpec((batch_tile, L, h_chunk), lambda i, j: (i, 0, j)),
                pl.BlockSpec((batch_tile, L, h_chunk), lambda i, j: (i, 0, j)),
                w_spec((L, d_mid)),
                w_spec((L, d_mid)),
                w_spec((L, d_mid)),
                w_spec((1, d_mid)),
                w_spec((d_mid, n_out)),
                w_spec((1, n_out)),
            ],
            out_specs=pl.BlockSpec((batch_tile, n_out), lambda i, j: (i, 0)),
            scratch_shapes=[pltpu.VMEM((batch_tile, L), jnp.float32),
                            pltpu.VMEM((batch_tile, L), jnp.float32)],
            compiler_params=pltpu.CompilerParams(
                dimension_semantics=("parallel", "arbitrary"),
                vmem_limit_bytes=vmem_limit_bytes),
            cost_estimate=cost,
        )(h1s, h2s, w1a, w1b, w1c, b1r, w2p, b2p)

    try:
        out = _run(single_buffer_weights=True)
    except Exception:
        # TODO(synk): pipeline_mode=pl.Buffered(1) rejected by this jax build;
        # fall back to default double-buffered constant operands.
        out = _run(single_buffer_weights=False)

    return out[:B, :num_labels]


def stub_pretrained_model(input_ids, attention_mask, embed_table):
    """Plain-JAX stand-in for the frozen BERT encoder: (B, L) ids -> (B, L, H)."""
    hidden = embed_table[input_ids]                       # (B, L, H)
    hidden = hidden * attention_mask[..., None].astype(hidden.dtype)
    return hidden


def reference_head(h1, h2, w1_t, b1, w2_t, b2, pool="mean"):
    if pool == "max":
        e1, e2 = jnp.max(h1, axis=2), jnp.max(h2, axis=2)
    else:
        e1, e2 = jnp.mean(h1, axis=2), jnp.mean(h2, axis=2)
    emb = jnp.concatenate([e1, e2, jnp.abs(e1 - e2)], axis=1)
    hmid = jnp.maximum(
        jnp.dot(emb, w1_t, precision=jax.lax.Precision.HIGHEST) + b1, 0.0)
    return jnp.dot(hmid, w2_t, precision=jax.lax.Precision.HIGHEST) + b2


if __name__ == "__main__":
    # Small shapes consistent with the module.
    B = 2            # batch
    L = 8            # max_length (pooled embedding width)
    H = 32           # BERT hidden size (reduced over by pooling)
    NUM_LABELS = 4
    VOCAB = 50
    POOL = "mean"

    D_IN = 3 * L                 # softmax_classifier input = max_length * 3
    D_MID = D_IN // 2            # int(input_channel / 2)

    key = jax.random.PRNGKey(0)
    k_ids1, k_ids2, k_emb, k_w1, k_b1, k_w2, k_b2 = jax.random.split(key, 7)

    # Deterministic synthetic "token" inputs for the two sentences.
    ids1 = jax.random.randint(k_ids1, (B, L), 0, VOCAB)
    ids2 = jax.random.randint(k_ids2, (B, L), 0, VOCAB)
    mask1 = jnp.ones((B, L), dtype=jnp.int32)
    mask2 = jnp.ones((B, L), dtype=jnp.int32)

    # Stub BERT parameters (deterministic).
    embed_table = jax.random.normal(k_emb, (VOCAB, H), dtype=jnp.float32) * 0.1

    # Classifier head parameters (Linear weights stored transposed: (in, out)).
    w1_t = jax.random.normal(k_w1, (D_IN, D_MID), dtype=jnp.float32) * 0.1
    b1 = jax.random.normal(k_b1, (1, D_MID), dtype=jnp.float32) * 0.01
    w2_t = jax.random.normal(k_w2, (D_MID, NUM_LABELS), dtype=jnp.float32) * 0.1
    b2 = jax.random.normal(k_b2, (1, NUM_LABELS), dtype=jnp.float32) * 0.01

    # Glue: "pretrained model" forward in plain JAX.
    h1 = stub_pretrained_model(ids1, mask1, embed_table)
    h2 = stub_pretrained_model(ids2, mask2, embed_table)

    out = bert_classifier_head(h1, h2, w1_t, b1, w2_t, b2, pool=POOL)
    out = jax.block_until_ready(out)

    # Reference sees the same bf16-rounded hidden states the kernel streams.
    h1r = h1.astype(jnp.bfloat16).astype(jnp.float32)
    h2r = h2.astype(jnp.bfloat16).astype(jnp.float32)
    ref = reference_head(h1r, h2r, w1_t, b1, w2_t, b2, pool=POOL)

    assert out.shape == (B, NUM_LABELS)
    assert jnp.allclose(out, ref, atol=1e-4, rtol=1e-4), "mismatch vs reference"

    print("KERNEL_OK")
</pallas_src>

<mosaic_0001>
module attributes {stable_mosaic.version = 11 : i64} {
  func.func @_head_kernel(%arg0: i32, %arg1: i32, %arg2: memref<8x8x32xbf16, #tpu.memory_space<vmem>>, %arg3: memref<8x8x32xbf16, #tpu.memory_space<vmem>>, %arg4: memref<8x12xf32, #tpu.memory_space<vmem>>, %arg5: memref<8x12xf32, #tpu.memory_space<vmem>>, %arg6: memref<8x12xf32, #tpu.memory_space<vmem>>, %arg7: memref<1x12xf32, #tpu.memory_space<vmem>>, %arg8: memref<12x128xf32, #tpu.memory_space<vmem>>, %arg9: memref<1x128xf32, #tpu.memory_space<vmem>>, %arg10: memref<8x128xf32, #tpu.memory_space<vmem>>, %arg11: memref<8x8xf32, #tpu.memory_space<vmem>>, %arg12: memref<8x8xf32, #tpu.memory_space<vmem>>) attributes {dimension_semantics = [#tpu.dimension_semantics<parallel>, #tpu.dimension_semantics<arbitrary>], iteration_bounds = array<i64: 1, 1>, scalar_prefetch = 0 : i64, scratch_operands = 2 : i64, tpu.core_type = #tpu.core_type<tc>, window_params = [{transform_indices = @transform_0, window_bounds = array<i64: 8, 8, 32>}, {transform_indices = @transform_1, window_bounds = array<i64: 8, 8, 32>}, {pipeline_mode = #tpu.pipeline_mode<synchronous>, transform_indices = @transform_2, window_bounds = array<i64: 8, 12>}, {pipeline_mode = #tpu.pipeline_mode<synchronous>, transform_indices = @transform_3, window_bounds = array<i64: 8, 12>}, {pipeline_mode = #tpu.pipeline_mode<synchronous>, transform_indices = @transform_4, window_bounds = array<i64: 8, 12>}, {pipeline_mode = #tpu.pipeline_mode<synchronous>, transform_indices = @transform_5, window_bounds = array<i64: 1, 12>}, {pipeline_mode = #tpu.pipeline_mode<synchronous>, transform_indices = @transform_6, window_bounds = array<i64: 12, 128>}, {pipeline_mode = #tpu.pipeline_mode<synchronous>, transform_indices = @transform_7, window_bounds = array<i64: 1, 128>}, {transform_indices = @transform_8, window_bounds = array<i64: 8, 128>}]} {
    %c0_i32 = arith.constant 0 : i32
    %0 = arith.cmpi eq, %arg1, %c0_i32 : i32
    %1 = arith.extui %0 : i1 to i32
    %c0_i32_0 = arith.constant 0 : i32
    %2 = arith.cmpi ne, %1, %c0_i32_0 : i32
    scf.if %2 {
      %cst_17 = arith.constant 0.000000e+00 : f32
      %18 = vector.broadcast %cst_17 : f32 to vector<8x8xf32>
      %c0_18 = arith.constant 0 : index
      %c0_19 = arith.constant 0 : index
      %19 = vector.load %arg11[%c0_18, %c0_19] : memref<8x8xf32, #tpu.memory_space<vmem>>, vector<8x8xf32>
      tpu.vector_store %arg11[%c0_18, %c0_19], %18 {strides = array<i32>} : memref<8x8xf32, #tpu.memory_space<vmem>>, vector<8x8xf32>,
      %cst_20 = arith.constant 0.000000e+00 : f32
      %20 = vector.broadcast %cst_20 : f32 to vector<8x8xf32>
      %c0_21 = arith.constant 0 : index
      %c0_22 = arith.constant 0 : index
      %21 = vector.load %arg12[%c0_21, %c0_22] : memref<8x8xf32, #tpu.memory_space<vmem>>, vector<8x8xf32>
      tpu.vector_store %arg12[%c0_21, %c0_22], %20 {strides = array<i32>} : memref<8x8xf32, #tpu.memory_space<vmem>>, vector<8x8xf32>,
    } else {
    }
    %c0 = arith.constant 0 : index
    %c0_1 = arith.constant 0 : index
    %3 = vector.load %arg11[%c0, %c0_1] : memref<8x8xf32, #tpu.memory_space<vmem>>, vector<8x8xf32>
    %c0_2 = arith.constant 0 : index
    %c0_3 = arith.constant 0 : index
    %c0_4 = arith.constant 0 : index
    %4 = vector.load %arg2[%c0_2, %c0_3, %c0_4] : memref<8x8x32xbf16, #tpu.memory_space<vmem>>, vector<8x8x32xbf16>
    %5 = arith.extf %4 : vector<8x8x32xbf16> to vector<8x8x32xf32>
    %cst = arith.constant dense<0.000000e+00> : vector<8x8xf32>
    %6 = vector.multi_reduction <add>, %5, %cst [2] : vector<8x8x32xf32> to vector<8x8xf32>
    %7 = arith.addf %3, %6 : vector<8x8xf32>
    %c0_5 = arith.constant 0 : index
    %c0_6 = arith.constant 0 : index
    %8 = vector.load %arg11[%c0_5, %c0_6] : memref<8x8xf32, #tpu.memory_space<vmem>>, vector<8x8xf32>
    tpu.vector_store %arg11[%c0_5, %c0_6], %7 {strides = array<i32>} : memref<8x8xf32, #tpu.memory_space<vmem>>, vector<8x8xf32>,
    %c0_7 = arith.constant 0 : index
    %c0_8 = arith.constant 0 : index
    %9 = vector.load %arg12[%c0_7, %c0_8] : memref<8x8xf32, #tpu.memory_space<vmem>>, vector<8x8xf32>
    %c0_9 = arith.constant 0 : index
    %c0_10 = arith.constant 0 : index
    %c0_11 = arith.constant 0 : index
    %10 = vector.load %arg3[%c0_9, %c0_10, %c0_11] : memref<8x8x32xbf16, #tpu.memory_space<vmem>>, vector<8x8x32xbf16>
    %11 = arith.extf %10 : vector<8x8x32xbf16> to vector<8x8x32xf32>
    %cst_12 = arith.constant dense<0.000000e+00> : vector<8x8xf32>
    %12 = vector.multi_reduction <add>, %11, %cst_12 [2] : vector<8x8x32xf32> to vector<8x8xf32>
    %13 = arith.addf %9, %12 : vector<8x8xf32>
    %c0_13 = arith.constant 0 : index
    %c0_14 = arith.constant 0 : index
    %14 = vector.load %arg12[%c0_13, %c0_14] : memref<8x8xf32, #tpu.memory_space<vmem>>, vector<8x8xf32>
    tpu.vector_store %arg12[%c0_13, %c0_14], %13 {strides = array<i32>} : memref<8x8xf32, #tpu.memory_space<vmem>>, vector<8x8xf32>,
    %c0_i32_15 = arith.constant 0 : i32
    %15 = arith.cmpi eq, %arg1, %c0_i32_15 : i32
    %16 = arith.extui %15 : i1 to i32
    %c0_i32_16 = arith.constant 0 : i32
    %17 = arith.cmpi ne, %16, %c0_i32_16 : i32
    scf.if %17 {
      %c0_17 = arith.constant 0 : index
      %c0_18 = arith.constant 0 : index
      %18 = vector.load %arg11[%c0_17, %c0_18] : memref<8x8xf32, #tpu.memory_space<vmem>>, vector<8x8xf32>
      %c0_19 = arith.constant 0 : index
      %c0_20 = arith.constant 0 : index
      %19 = vector.load %arg12[%c0_19, %c0_20] : memref<8x8xf32, #tpu.memory_space<vmem>>, vector<8x8xf32>
      %20 = arith.subf %18, %19 : vector<8x8xf32>
      %21 = math.absf %20 : vector<8x8xf32>
      %c0_21 = arith.constant 0 : index
      %c0_22 = arith.constant 0 : index
      %22 = vector.load %arg4[%c0_21, %c0_22] : memref<8x12xf32, #tpu.memory_space<vmem>>, vector<8x12xf32>
      %cst_23 = arith.constant dense<0.000000e+00> : vector<8x12xf32>
      %23 = tpu.matmul %18, %22, %cst_23 {dimension_numbers = #tpu.dot_dimension_numbers<[1], [0], [0], [1], [0, 0, 1, 1], [], []>} : vector<8x8xf32>, vector<8x12xf32>, vector<8x12xf32> -> vector<8x12xf32>
      %c0_24 = arith.constant 0 : index
      %c0_25 = arith.constant 0 : index
      %24 = vector.load %arg5[%c0_24, %c0_25] : memref<8x12xf32, #tpu.memory_space<vmem>>, vector<8x12xf32>
      %cst_26 = arith.constant dense<0.000000e+00> : vector<8x12xf32>
      %25 = tpu.matmul %19, %24, %cst_26 {dimension_numbers = #tpu.dot_dimension_numbers<[1], [0], [0], [1], [0, 0, 1, 1], [], []>} : vector<8x8xf32>, vector<8x12xf32>, vector<8x12xf32> -> vector<8x12xf32>
      %26 = arith.addf %23, %25 : vector<8x12xf32>
      %c0_27 = arith.constant 0 : index
      %c0_28 = arith.constant 0 : index
      %27 = vector.load %arg6[%c0_27, %c0_28] : memref<8x12xf32, #tpu.memory_space<vmem>>, vector<8x12xf32>
      %cst_29 = arith.constant dense<0.000000e+00> : vector<8x12xf32>
      %28 = tpu.matmul %21, %27, %cst_29 {dimension_numbers = #tpu.dot_dimension_numbers<[1], [0], [0], [1], [0, 0, 1, 1], [], []>} : vector<8x8xf32>, vector<8x12xf32>, vector<8x12xf32> -> vector<8x12xf32>
      %29 = arith.addf %26, %28 : vector<8x12xf32>
      %c0_30 = arith.constant 0 : index
      %c0_31 = arith.constant 0 : index
      %30 = vector.load %arg7[%c0_30, %c0_31] : memref<1x12xf32, #tpu.memory_space<vmem>>, vector<1x12xf32>
      %31 = vector.broadcast %30 : vector<1x12xf32> to vector<8x12xf32>
      %32 = arith.addf %29, %31 : vector<8x12xf32>
      %cst_32 = arith.constant 0.000000e+00 : f32
      %33 = vector.broadcast %cst_32 : f32 to vector<8x12xf32>
      %34 = arith.maximumf %32, %33 : vector<8x12xf32>
      %c0_33 = arith.constant 0 : index
      %c0_34 = arith.constant 0 : index
      %35 = vector.load %arg8[%c0_33, %c0_34] : memref<12x128xf32, #tpu.memory_space<vmem>>, vector<12x128xf32>
      %cst_35 = arith.constant dense<0.000000e+00> : vector<8x128xf32>
      %36 = tpu.matmul %34, %35, %cst_35 {dimension_numbers = #tpu.dot_dimension_numbers<[1], [0], [0], [1], [0, 0, 1, 1], [], []>} : vector<8x12xf32>, vector<12x128xf32>, vector<8x128xf32> -> vector<8x128xf32>
      %c0_36 = arith.constant 0 : index
      %c0_37 = arith.constant 0 : index
      %37 = vector.load %arg9[%c0_36, %c0_37] : memref<1x128xf32, #tpu.memory_space<vmem>>, vector<1x128xf32>
      %38 = vector.broadcast %37 : vector<1x128xf32> to vector<8x128xf32>
      %39 = arith.addf %36, %38 : vector<8x128xf32>
      %c0_38 = arith.constant 0 : index
      %c0_39 = arith.constant 0 : index
      %40 = vector.load %arg10[%c0_38, %c0_39] : memref<8x128xf32, #tpu.memory_space<vmem>>, vector<8x128xf32>
      tpu.vector_store %arg10[%c0_38, %c0_39], %39 {strides = array<i32>} : memref<8x128xf32, #tpu.memory_space<vmem>>, vector<8x128xf32>,
    } else {
    }
    return
  }
  func.func @transform_0(%arg0: i32, %arg1: i32) -> (i32, i32, i32) {
    %c0_i32 = arith.constant 0 : i32
    %c0_i32_0 = arith.constant 0 : i32
    return %arg0, %c0_i32, %arg1 : i32, i32, i32
  }
  func.func @transform_1(%arg0: i32, %arg1: i32) -> (i32, i32, i32) {
    %c0_i32 = arith.constant 0 : i32
    %c0_i32_0 = arith.constant 0 : i32
    return %arg0, %c0_i32, %arg1 : i32, i32, i32
  }
  func.func @transform_2(%arg0: i32, %arg1: i32) -> (i32, i32) {
    %c0_i32 = arith.constant 0 : i32
    %c0_i32_0 = arith.constant 0 : i32
    %c0_i32_1 = arith.constant 0 : i32
    return %c0_i32, %c0_i32_0 : i32, i32
  }
  func.func @transform_3(%arg0: i32, %arg1: i32) -> (i32, i32) {
    %c0_i32 = arith.constant 0 : i32
    %c0_i32_0 = arith.constant 0 : i32
    %c0_i32_1 = arith.constant 0 : i32
    return %c0_i32, %c0_i32_0 : i32, i32
  }
  func.func @transform_4(%arg0: i32, %arg1: i32) -> (i32, i32) {
    %c0_i32 = arith.constant 0 : i32
    %c0_i32_0 = arith.constant 0 : i32
    %c0_i32_1 = arith.constant 0 : i32
    return %c0_i32, %c0_i32_0 : i32, i32
  }
  func.func @transform_5(%arg0: i32, %arg1: i32) -> (i32, i32) {
    %c0_i32 = arith.constant 0 : i32
    %c0_i32_0 = arith.constant 0 : i32
    %c0_i32_1 = arith.constant 0 : i32
    return %c0_i32, %c0_i32_0 : i32, i32
  }
  func.func @transform_6(%arg0: i32, %arg1: i32) -> (i32, i32) {
    %c0_i32 = arith.constant 0 : i32
    %c0_i32_0 = arith.constant 0 : i32
    %c0_i32_1 = arith.constant 0 : i32
    return %c0_i32, %c0_i32_0 : i32, i32
  }
  func.func @transform_7(%arg0: i32, %arg1: i32) -> (i32, i32) {
    %c0_i32 = arith.constant 0 : i32
    %c0_i32_0 = arith.constant 0 : i32
    %c0_i32_1 = arith.constant 0 : i32
    return %c0_i32, %c0_i32_0 : i32, i32
  }
  func.func @transform_8(%arg0: i32, %arg1: i32) -> (i32, i32) {
    %c0_i32 = arith.constant 0 : i32
    %c0_i32_0 = arith.constant 0 : i32
    return %arg0, %c0_i32 : i32, i32
  }
}

module attributes {stable_mosaic.version = 11 : i64} {
  func.func @_head_kernel(%arg0: i32, %arg1: i32, %arg2: memref<8x8x32xbf16, #tpu.memory_space<vmem>>, %arg3: memref<8x8x32xbf16, #tpu.memory_space<vmem>>, %arg4: memref<8x12xf32, #tpu.memory_space<vmem>>, %arg5: memref<8x12xf32, #tpu.memory_space<vmem>>, %arg6: memref<8x12xf32, #tpu.memory_space<vmem>>, %arg7: memref<1x12xf32, #tpu.memory_space<vmem>>, %arg8: memref<12x128xf32, #tpu.memory_space<vmem>>, %arg9: memref<1x128xf32, #tpu.memory_space<vmem>>, %arg10: memref<8x128xf32, #tpu.memory_space<vmem>>, %arg11: memref<8x8xf32, #tpu.memory_space<vmem>>, %arg12: memref<8x8xf32, #tpu.memory_space<vmem>>) attributes {dimension_semantics = [#tpu.dimension_semantics<parallel>, #tpu.dimension_semantics<arbitrary>], iteration_bounds = array<i64: 1, 1>, scalar_prefetch = 0 : i64, scratch_operands = 2 : i64, tpu.core_type = #tpu.core_type<tc>, window_params = [{transform_indices = @transform_0, window_bounds = array<i64: 8, 8, 32>}, {transform_indices = @transform_1, window_bounds = array<i64: 8, 8, 32>}, {pipeline_mode = #tpu.pipeline_mode<synchronous>, transform_indices = @transform_2, window_bounds = array<i64: 8, 12>}, {pipeline_mode = #tpu.pipeline_mode<synchronous>, transform_indices = @transform_3, window_bounds = array<i64: 8, 12>}, {pipeline_mode = #tpu.pipeline_mode<synchronous>, transform_indices = @transform_4, window_bounds = array<i64: 8, 12>}, {pipeline_mode = #tpu.pipeline_mode<synchronous>, transform_indices = @transform_5, window_bounds = array<i64: 1, 12>}, {pipeline_mode = #tpu.pipeline_mode<synchronous>, transform_indices = @transform_6, window_bounds = array<i64: 12, 128>}, {pipeline_mode = #tpu.pipeline_mode<synchronous>, transform_indices = @transform_7, window_bounds = array<i64: 1, 128>}, {transform_indices = @transform_8, window_bounds = array<i64: 8, 128>}]} {
    %c0_i32 = arith.constant 0 : i32
    %0 = arith.cmpi eq, %arg1, %c0_i32 : i32
    %1 = arith.extui %0 : i1 to i32
    %c0_i32_0 = arith.constant 0 : i32
    %2 = arith.cmpi ne, %1, %c0_i32_0 : i32
    scf.if %2 {
      %cst_17 = arith.constant 0.000000e+00 : f32
      %18 = vector.broadcast %cst_17 : f32 to vector<8x8xf32>
      %c0_18 = arith.constant 0 : index
      %c0_19 = arith.constant 0 : index
      %19 = vector.load %arg11[%c0_18, %c0_19] : memref<8x8xf32, #tpu.memory_space<vmem>>, vector<8x8xf32>
      tpu.vector_store %arg11[%c0_18, %c0_19], %18 {strides = array<i32>} : memref<8x8xf32, #tpu.memory_space<vmem>>, vector<8x8xf32>,
      %cst_20 = arith.constant 0.000000e+00 : f32
      %20 = vector.broadcast %cst_20 : f32 to vector<8x8xf32>
      %c0_21 = arith.constant 0 : index
      %c0_22 = arith.constant 0 : index
      %21 = vector.load %arg12[%c0_21, %c0_22] : memref<8x8xf32, #tpu.memory_space<vmem>>, vector<8x8xf32>
      tpu.vector_store %arg12[%c0_21, %c0_22], %20 {strides = array<i32>} : memref<8x8xf32, #tpu.memory_space<vmem>>, vector<8x8xf32>,
    } else {
    }
    %c0 = arith.constant 0 : index
    %c0_1 = arith.constant 0 : index
    %3 = vector.load %arg11[%c0, %c0_1] : memref<8x8xf32, #tpu.memory_space<vmem>>, vector<8x8xf32>
    %c0_2 = arith.constant 0 : index
    %c0_3 = arith.constant 0 : index
    %c0_4 = arith.constant 0 : index
    %4 = vector.load %arg2[%c0_2, %c0_3, %c0_4] : memref<8x8x32xbf16, #tpu.memory_space<vmem>>, vector<8x8x32xbf16>
    %5 = arith.extf %4 : vector<8x8x32xbf16> to vector<8x8x32xf32>
    %cst = arith.constant dense<0.000000e+00> : vector<8x8xf32>
    %6 = vector.multi_reduction <add>, %5, %cst [2] : vector<8x8x32xf32> to vector<8x8xf32>
    %7 = arith.addf %3, %6 : vector<8x8xf32>
    %c0_5 = arith.constant 0 : index
    %c0_6 = arith.constant 0 : index
    %8 = vector.load %arg11[%c0_5, %c0_6] : memref<8x8xf32, #tpu.memory_space<vmem>>, vector<8x8xf32>
    tpu.vector_store %arg11[%c0_5, %c0_6], %7 {strides = array<i32>} : memref<8x8xf32, #tpu.memory_space<vmem>>, vector<8x8xf32>,
    %c0_7 = arith.constant 0 : index
    %c0_8 = arith.constant 0 : index
    %9 = vector.load %arg12[%c0_7, %c0_8] : memref<8x8xf32, #tpu.memory_space<vmem>>, vector<8x8xf32>
    %c0_9 = arith.constant 0 : index
    %c0_10 = arith.constant 0 : index
    %c0_11 = arith.constant 0 : index
    %10 = vector.load %arg3[%c0_9, %c0_10, %c0_11] : memref<8x8x32xbf16, #tpu.memory_space<vmem>>, vector<8x8x32xbf16>
    %11 = arith.extf %10 : vector<8x8x32xbf16> to vector<8x8x32xf32>
    %cst_12 = arith.constant dense<0.000000e+00> : vector<8x8xf32>
    %12 = vector.multi_reduction <add>, %11, %cst_12 [2] : vector<8x8x32xf32> to vector<8x8xf32>
    %13 = arith.addf %9, %12 : vector<8x8xf32>
    %c0_13 = arith.constant 0 : index
    %c0_14 = arith.constant 0 : index
    %14 = vector.load %arg12[%c0_13, %c0_14] : memref<8x8xf32, #tpu.memory_space<vmem>>, vector<8x8xf32>
    tpu.vector_store %arg12[%c0_13, %c0_14], %13 {strides = array<i32>} : memref<8x8xf32, #tpu.memory_space<vmem>>, vector<8x8xf32>,
    %c0_i32_15 = arith.constant 0 : i32
    %15 = arith.cmpi eq, %arg1, %c0_i32_15 : i32
    %16 = arith.extui %15 : i1 to i32
    %c0_i32_16 = arith.constant 0 : i32
    %17 = arith.cmpi ne, %16, %c0_i32_16 : i32
    scf.if %17 {
      %c0_17 = arith.constant 0 : index
      %c0_18 = arith.constant 0 : index
      %18 = vector.load %arg11[%c0_17, %c0_18] : memref<8x8xf32, #tpu.memory_space<vmem>>, vector<8x8xf32>
      %c0_19 = arith.constant 0 : index
      %c0_20 = arith.constant 0 : index
      %19 = vector.load %arg12[%c0_19, %c0_20] : memref<8x8xf32, #tpu.memory_space<vmem>>, vector<8x8xf32>
      %20 = arith.subf %18, %19 : vector<8x8xf32>
      %21 = math.absf %20 : vector<8x8xf32>
      %c0_21 = arith.constant 0 : index
      %c0_22 = arith.constant 0 : index
      %22 = vector.load %arg4[%c0_21, %c0_22] : memref<8x12xf32, #tpu.memory_space<vmem>>, vector<8x12xf32>
      %cst_23 = arith.constant dense<0.000000e+00> : vector<8x12xf32>
      %23 = tpu.matmul %18, %22, %cst_23 {dimension_numbers = #tpu.dot_dimension_numbers<[1], [0], [0], [1], [0, 0, 1, 1], [], []>} : vector<8x8xf32>, vector<8x12xf32>, vector<8x12xf32> -> vector<8x12xf32>
      %c0_24 = arith.constant 0 : index
      %c0_25 = arith.constant 0 : index
      %24 = vector.load %arg5[%c0_24, %c0_25] : memref<8x12xf32, #tpu.memory_space<vmem>>, vector<8x12xf32>
      %cst_26 = arith.constant dense<0.000000e+00> : vector<8x12xf32>
      %25 = tpu.matmul %19, %24, %cst_26 {dimension_numbers = #tpu.dot_dimension_numbers<[1], [0], [0], [1], [0, 0, 1, 1], [], []>} : vector<8x8xf32>, vector<8x12xf32>, vector<8x12xf32> -> vector<8x12xf32>
      %26 = arith.addf %23, %25 : vector<8x12xf32>
      %c0_27 = arith.constant 0 : index
      %c0_28 = arith.constant 0 : index
      %27 = vector.load %arg6[%c0_27, %c0_28] : memref<8x12xf32, #tpu.memory_space<vmem>>, vector<8x12xf32>
      %cst_29 = arith.constant dense<0.000000e+00> : vector<8x12xf32>
      %28 = tpu.matmul %21, %27, %cst_29 {dimension_numbers = #tpu.dot_dimension_numbers<[1], [0], [0], [1], [0, 0, 1, 1], [], []>} : vector<8x8xf32>, vector<8x12xf32>, vector<8x12xf32> -> vector<8x12xf32>
      %29 = arith.addf %26, %28 : vector<8x12xf32>
      %c0_30 = arith.constant 0 : index
      %c0_31 = arith.constant 0 : index
      %30 = vector.load %arg7[%c0_30, %c0_31] : memref<1x12xf32, #tpu.memory_space<vmem>>, vector<1x12xf32>
      %31 = vector.broadcast %30 : vector<1x12xf32> to vector<8x12xf32>
      %32 = arith.addf %29, %31 : vector<8x12xf32>
      %cst_32 = arith.constant 0.000000e+00 : f32
      %33 = vector.broadcast %cst_32 : f32 to vector<8x12xf32>
      %34 = arith.maximumf %32, %33 : vector<8x12xf32>
      %c0_33 = arith.constant 0 : index
      %c0_34 = arith.constant 0 : index
      %35 = vector.load %arg8[%c0_33, %c0_34] : memref<12x128xf32, #tpu.memory_space<vmem>>, vector<12x128xf32>
      %cst_35 = arith.constant dense<0.000000e+00> : vector<8x128xf32>
      %36 = tpu.matmul %34, %35, %cst_35 {dimension_numbers = #tpu.dot_dimension_numbers<[1], [0], [0], [1], [0, 0, 1, 1], [], []>} : vector<8x12xf32>, vector<12x128xf32>, vector<8x128xf32> -> vector<8x128xf32>
      %c0_36 = arith.constant 0 : index
      %c0_37 = arith.constant 0 : index
      %37 = vector.load %arg9[%c0_36, %c0_37] : memref<1x128xf32, #tpu.memory_space<vmem>>, vector<1x128xf32>
      %38 = vector.broadcast %37 : vector<1x128xf32> to vector<8x128xf32>
      %39 = arith.addf %36, %38 : vector<8x128xf32>
      %c0_38 = arith.constant 0 : index
      %c0_39 = arith.constant 0 : index
      %40 = vector.load %arg10[%c0_38, %c0_39] : memref<8x128xf32, #tpu.memory_space<vmem>>, vector<8x128xf32>
      tpu.vector_store %arg10[%c0_38, %c0_39], %39 {strides = array<i32>} : memref<8x128xf32, #tpu.memory_space<vmem>>, vector<8x128xf32>,
    } else {
    }
    return
  }
  func.func @transform_0(%arg0: i32, %arg1: i32) -> (i32, i32, i32) {
    %c0_i32 = arith.constant 0 : i32
    %c0_i32_0 = arith.constant 0 : i32
    return %arg0, %c0_i32, %arg1 : i32, i32, i32
  }
  func.func @transform_1(%arg0: i32, %arg1: i32) -> (i32, i32, i32) {
    %c0_i32 = arith.constant 0 : i32
    %c0_i32_0 = arith.constant 0 : i32
    return %arg0, %c0_i32, %arg1 : i32, i32, i32
  }
  func.func @transform_2(%arg0: i32, %arg1: i32) -> (i32, i32) {
    %c0_i32 = arith.constant 0 : i32
    %c0_i32_0 = arith.constant 0 : i32
    %c0_i32_1 = arith.constant 0 : i32
    return %c0_i32, %c0_i32_0 : i32, i32
  }
  func.func @transform_3(%arg0: i32, %arg1: i32) -> (i32, i32) {
    %c0_i32 = arith.constant 0 : i32
    %c0_i32_0 = arith.constant 0 : i32
    %c0_i32_1 = arith.constant 0 : i32
    return %c0_i32, %c0_i32_0 : i32, i32
  }
  func.func @transform_4(%arg0: i32, %arg1: i32) -> (i32, i32) {
    %c0_i32 = arith.constant 0 : i32
    %c0_i32_0 = arith.constant 0 : i32
    %c0_i32_1 = arith.constant 0 : i32
    return %c0_i32, %c0_i32_0 : i32, i32
  }
  func.func @transform_5(%arg0: i32, %arg1: i32) -> (i32, i32) {
    %c0_i32 = arith.constant 0 : i32
    %c0_i32_0 = arith.constant 0 : i32
    %c0_i32_1 = arith.constant 0 : i32
    return %c0_i32, %c0_i32_0 : i32, i32
  }
  func.func @transform_6(%arg0: i32, %arg1: i32) -> (i32, i32) {
    %c0_i32 = arith.constant 0 : i32
    %c0_i32_0 = arith.constant 0 : i32
    %c0_i32_1 = arith.constant 0 : i32
    return %c0_i32, %c0_i32_0 : i32, i32
  }
  func.func @transform_7(%arg0: i32, %arg1: i32) -> (i32, i32) {
    %c0_i32 = arith.constant 0 : i32
    %c0_i32_0 = arith.constant 0 : i32
    %c0_i32_1 = arith.constant 0 : i32
    return %c0_i32, %c0_i32_0 : i32, i32
  }
  func.func @transform_8(%arg0: i32, %arg1: i32) -> (i32, i32) {
    %c0_i32 = arith.constant 0 : i32
    %c0_i32_0 = arith.constant 0 : i32
    return %arg0, %c0_i32 : i32, i32
  }
}

</mosaic_0001>

<bundles_post_ra>
// kernel: tpu_custom_call.1
= control target key start
LH: loop header
LB: loop body
LE: loop exit
PB: predicated region body
PF: predicated region fallthrough
CT: control target
= control target key end

     0   :  { %13 = vsyncpa [#allocation5], 0  ;;  %s767_s0 = inlined_call_operand.hbm [shape: bf16[8,8,32], index: 0, kind: input, shape index: {}]   ;;  %s768_s1 = inlined_call_operand.hbm [shape: bf16[8,8,32], index: 1, kind: input, shape index: {}]   ;;  %s769_s2 = inlined_call_operand.hbm [shape: f32[8,12], index: 2, kind: input, shape index: {}]   ;;  %s770_s3 = inlined_call_operand.hbm [shape: f32[8,12], index: 3, kind: input, shape index: {}]   ;;  %s771_s4 = inlined_call_operand.hbm [shape: f32[8,12], index: 4, kind: input, shape index: {}]   ;;  %s772_s5 = inlined_call_operand.vmem [shape: f32[1,12], index: 5, kind: input, shape index: {}]   ;;  %s773_s6 = inlined_call_operand.hbm [shape: f32[12,128], index: 6, kind: input, shape index: {}]   ;;  %s774_s7 = inlined_call_operand.vmem [shape: f32[1,128], index: 7, kind: input, shape index: {}]   ;;  %s775_s8 = inlined_call_operand.hbm [shape: f32[8,128], index: 8, kind: output, shape index: {}]  }
   0x1   :  { %14 = vsyncpa [#allocation8], 0 }
   0x2   :  { %15 = vsyncpa [#allocation11], 0 }
   0x3   :  { %16 = vsyncpa [#allocation14], 0 }
   0x4   :  { %17 = vsyncpa [#allocation6], 0  ;;  %s35_s29 = sshll.u32 %s768_s1, 4  ;;  %s646_s30 = smov [#allocation7]   ;;  %s36_s29 = int_to_ptr.hbm [resolvable:$true] %s35_s29 }
   0x5   :  { %s37_s9 = sshll.u32 %s646_s30, 4  ;;  %s60_s12 = sshll.u32 %s770_s3, 4  ;;  %s38_s9 = int_to_ptr.vmem [resolvable:$true] %s37_s9  ;;  %s61_s12 = int_to_ptr.hbm [resolvable:$true] %s60_s12 }
   0x6   :  { %s647_s13 = smov 64   ;;  %s648_s14 = smov 4  }
   0x7   :  { %43 = dma.hbm_to_vmem [thread:$0]  %s36_s29, 512, %s38_s9, [#allocation8], %s647_s13, %s647_s13, %s648_s14  }
   0x8   :  { %s649_s15 = smov [#allocation10]   ;;  %s22_s19 = sshll.u32 %s767_s0, 4  ;;  %s23_s19 = int_to_ptr.hbm [resolvable:$true] %s22_s19 }
   0x9   :  { %s62_s16 = sshll.u32 %s649_s15, 4  ;;  %s49_s21 = sshll.u32 %s769_s2, 4  ;;  %s63_s16 = int_to_ptr.vmem [resolvable:$true] %s62_s16  ;;  %s50_s21 = int_to_ptr.hbm [resolvable:$true] %s49_s21 }
   0xa   :  { %65 = dma.hbm_to_vmem [thread:$0]  %s61_s12, 128, %s63_s16, [#allocation11]  }
   0xb   :  { %s650_s22 = smov [#allocation4]   ;;  %s651_s3 = smov [#allocation9]  }
   0xc   :  { %s24_s23 = sshll.u32 %s650_s22, 4  ;;  %s51_s24 = sshll.u32 %s651_s3, 4  ;;  %s25_s23 = int_to_ptr.vmem [resolvable:$true] %s24_s23  ;;  %s52_s24 = int_to_ptr.vmem [resolvable:$true] %s51_s24 }
   0xd   :  { %30 = dma.hbm_to_vmem [thread:$0]  %s23_s19, 512, %s25_s23, [#allocation5], %s647_s13, %s647_s13, %s648_s14  }
   0xe   :  { %s71_s27 = sshll.u32 %s771_s4, 4  ;;  %s83_s29 = sshll.u32 %s773_s6, 4  ;;  %s72_s27 = int_to_ptr.hbm [resolvable:$true] %s71_s27  ;;  %s84_s29 = int_to_ptr.hbm [resolvable:$true] %s83_s29 }
   0xf   :  { %54 = dma.hbm_to_vmem [thread:$0]  %s50_s21, 128, %s52_s24, [#allocation8]  }
  0x10   :  { %s652_s30 = smov [#allocation12]   ;;  %s653_s9 = smov [#allocation13]  }
  0x11   :  { %s73_s2 = sshll.u32 %s652_s30, 4  ;;  %s85_s10 = sshll.u32 %s653_s9, 4  ;;  %s74_s2 = int_to_ptr.vmem [resolvable:$true] %s73_s2  ;;  %s86_s10 = int_to_ptr.vmem [resolvable:$true] %s85_s10 }
  0x12   :  { %76 = dma.hbm_to_vmem [thread:$0]  %s72_s27, 128, %s74_s2, [#allocation11]  }
  0x13   :  { %s654_s11 = smov 128   ;;  %s655_s12 = smov 8  }
  0x14   :  { %91 = dma.hbm_to_vmem [thread:$0]  %s84_s29, 256, %s86_s10, [#allocation14], %s654_s11, %s654_s11, %s655_s12  }
  0x15   :  { %636 = dma.done.wait [#allocation5], 512  }
  0x16   :  { %637 = vsyncadd [#allocation5], 4294966784 }
  0x17   :  { %638 = dma.done.wait [#allocation8], 640  }
  0x18   :  { %639 = vsyncadd [#allocation8], 4294966656 }
  0x19   :  { %640 = dma.done.wait [#allocation11], 256  }
  0x1a   :  { %641 = vsyncadd [#allocation11], 4294967040 }
  0x1b   :  { %642 = dma.done.wait [#allocation14], 256  }
  0x1c   :  { %643 = vsyncadd [#allocation14], 4294967040  ;;  %vm142_vm0 = vcmask 261120   ;;  %v433_v0 = vld [vmem:[#allocation7] sm:$0xff]   ;;  %v448_v2 = vld [vmem:[#allocation4 + $0x8] sm:$0xff]   ;;  %vm122_vm1 = vcmask 64512   ;;  %v175_v49 = vlaneseq }
  0x1d   :  { %v417_v1 = vld [vmem:[#allocation4] sm:$0xff]   ;;  %v434_v3 = vunpack.c.l.bf16 %v433_v0  ;;  %v422_v5 = vunpack.c.l.bf16 %v448_v2  ;;  %v451_v9 = vld [vmem:[#allocation7 + $0x8] sm:$0xff]   ;;  %v435_v10 = vunpack.c.h.bf16 %v433_v0  ;;  %v449_v16 = vld [vmem:[#allocation4 + $0x10] sm:$0xff]   ;;  %v423_v18 = vunpack.c.h.bf16 %v448_v2  ;;  %s657_s15 = smov [#allocation15]   ;;  %s398_s19 = sshll.u32 %s775_s8, 4  ;;  %s399_s19 = int_to_ptr.hbm [resolvable:$true] %s398_s19 }
  0x1e   :  { %v418_v4 = vunpack.c.l.bf16 %v417_v1  ;;  %v419_v11 = vunpack.c.h.bf16 %v417_v1  ;;  %v438_v12 = vunpack.c.l.bf16 %v451_v9  ;;  %v439_v17 = vunpack.c.h.bf16 %v451_v9  ;;  %v452_v23 = vld [vmem:[#allocation7 + $0x10] sm:$0xff]   ;;  %v453_v30 = vld [vmem:[#allocation7 + $0x18] sm:$0xff]   ;;  %v277_v47 = vld [vmem:[#allocation9] sm:$0xff]  ;;  %s396_s16 = sshll.u32 %s657_s15, 4  ;;  %s397_s16 = int_to_ptr.vmem [resolvable:$true] %s396_s16 }
  0x1f   :  { %v220_v6 = vsel %vm142_vm0, %v434_v3, 0.0  ;;  %v149_v8 = vsel %vm142_vm0, %v422_v5, 0.0  ;;  %v223_v13 = vsel %vm142_vm0, %v435_v10, 0.0  ;;  %v426_v19 = vunpack.c.l.bf16 %v449_v16  ;;  %v450_v31 = vld [vmem:[#allocation4 + $0x18] sm:$0xff]   ;;  %320 = vmatpush.msra.mxu1 %v277_v47  ;;  %v278_v48 = vld [vmem:[#allocation10] sm:$0xff]  ;;  %v325_v57 = vld [vmem:[#allocation12] sm:$0xff] }
  0x20   :  { %v143_v7 = vsel %vm142_vm0, %v418_v4, 0.0  ;;  %221 = vadd.xlane.f32.xlu1 %v220_v6  ;;  %150 = vadd.xlane.f32.xlu2 %v149_v8  ;;  %v146_v14 = vsel %vm142_vm0, %v419_v11, 0.0  ;;  %v226_v15 = vsel %vm142_vm0, %v438_v12, 0.0  ;;  %v229_v20 = vsel %vm142_vm0, %v439_v17, 0.0 }
  0x21   :  { %144 = vadd.xlane.f32.xlu0 %v143_v7  ;;  %v152_v21 = vsel %vm142_vm0, %v423_v18, 0.0  ;;  %v155_v22 = vsel %vm142_vm0, %v426_v19, 0.0  ;;  %v427_v24 = vunpack.c.h.bf16 %v449_v16  ;;  %v442_v25 = vunpack.c.l.bf16 %v452_v23  ;;  %297 = vmatpush.msra.mxu0 %v278_v48 }
  0x22   :  { %v443_v26 = vunpack.c.h.bf16 %v452_v23  ;;  %v446_v32 = vunpack.c.l.bf16 %v453_v30  ;;  %v430_v33 = vunpack.c.l.bf16 %v450_v31  ;;  %v431_v34 = vunpack.c.h.bf16 %v450_v31  ;;  %344 = vmatpush.msra.mxu2 %v325_v57 }
  0x23   :  { %v158_v27 = vsel %vm142_vm0, %v427_v24, 0.0  ;;  %v232_v28 = vsel %vm142_vm0, %v442_v25, 0.0  ;;  %v447_v38 = vunpack.c.h.bf16 %v453_v30  ;;  %v656_v40 = vmov 0.0  }
  0x24   :  { %v235_v29 = vsel %vm142_vm0, %v443_v26, 0.0  ;;  %v238_v35 = vsel %vm142_vm0, %v446_v32, 0.0  ;;  %v161_v36 = vsel %vm142_vm0, %v430_v33, 0.0  ;;  %v164_v37 = vsel %vm142_vm0, %v431_v34, 0.0  ;;  %123 = vst.msk [vmem:[#allocation2] sm:$0xff] %vm122_vm1, %v656_v40 }
  0x25   :  { %v241_v39 = vsel %vm142_vm0, %v447_v38, 0.0  ;;  %124 = vst.msk [vmem:[#allocation3] sm:$0xff] %vm122_vm1, %v656_v40  ;;  %v176_v53 = vand.u32 127, %v175_v49  ;;  %vm185_vm2 = vcmask 1041409   ;;  %vm187_vm3 = vcmask 1042434  }
  0x26   :  { %vm189_vm4 = vcmask 1043459   ;;  %vm191_vm5 = vcmask 1044484   ;;  %vm193_vm6 = vcmask 1045509   ;;  %vm195_vm7 = vcmask 1046534  }
  0x27   :  { %vm197_vm8 = vcmask 1047559   ;;  %vm366_vm9 = vcmask 1043456   ;;  %vm362_vm10 = vcmask 97280  }
  0x28   :  { %224 = vadd.xlane.f32.xlu1 %v223_v13  ;;  %227 = vadd.xlane.f32.xlu2 %v226_v15 }
  0x29   :  { %147 = vadd.xlane.f32.xlu0 %v146_v14 }
  0x2b   :  { %v125_v14 = vld [vmem:[#allocation2] sm:$0xff] }
  0x30   :  { %230 = vadd.xlane.f32.xlu1 %v229_v20  ;;  %156 = vadd.xlane.f32.xlu2 %v155_v22 }
  0x31   :  { %153 = vadd.xlane.f32.xlu0 %v152_v21 }
  0x38   :  { %159 = vadd.xlane.f32.xlu1 %v158_v27  ;;  %236 = vadd.xlane.f32.xlu2 %v235_v29  ;;  %v203_v27 = vld [vmem:[#allocation3] sm:$0xff] }
  0x39   :  { %233 = vadd.xlane.f32.xlu0 %v232_v28 }
  0x40   :  { %239 = vadd.xlane.f32.xlu1 %v238_v35  ;;  %165 = vadd.xlane.f32.xlu2 %v164_v37  ;;  %v356_v37 = vld [vmem:[#allocation13] sm:$0xff] }
  0x41   :  { %162 = vadd.xlane.f32.xlu0 %v161_v36  ;;  %v357_v36 = vld [vmem:[#allocation13 + $0x8] sm:$0xf] }
  0x42   :  { %414 = vmatpush.msk.msra.mxu3 %vm366_vm9, %v357_v36 }
  0x44   :  { %385 = vmatpush.msra.mxu3 %v356_v37 }
  0x49   :  { %242 = vadd.xlane.f32.xlu0 %v241_v39 }
  0x93   :  { %v222_v41 = vpop.xlane.xlu1 %221  ;;  %v151_v43 = vpop.xlane.xlu2 %150 }
  0x94   :  { %v145_v42 = vpop.xlane.xlu0 %144  ;;  %v179_v58 = vperm.slane %v151_v43, %v176_v53  ;;  %v252_v63 = vperm.slane %v222_v41, %v176_v53  ;;  %v466_v41 = vld [vmem:[%s772_s5] ss:$0 sm:$0xff] }
  0x95   :  { %v177_v55 = vperm.slane %v145_v42, %v176_v53 }
  0x9b   :  { %v225_v44 = vpop.xlane.xlu1 %224  ;;  %v228_v46 = vpop.xlane.xlu2 %227 }
  0x9c   :  { %v148_v45 = vpop.xlane.xlu0 %147  ;;  %v253_v0 = vperm.slane %v225_v44, %v176_v53  ;;  %v254_v5 = vperm.slane %v228_v46, %v176_v53  ;;  %v467_v46 = vld [vmem:[%s774_s7] ss:$0 sm:$0xff] }
  0x9d   :  { %v178_v54 = vperm.slane %v148_v45, %v176_v53 }
  0x9e   :  { %v260_v7 = vsel %vm185_vm2, %v253_v0, %v252_v63 }
  0x9f   :  { %v186_v61 = vsel %vm185_vm2, %v178_v54, %v177_v55  ;;  %v261_v18 = vsel %vm187_vm3, %v254_v5, %v260_v7 }
  0xa0   :  { %v188_v1 = vsel %vm187_vm3, %v179_v58, %v186_v61 }
  0xa3   :  { %v231_v50 = vpop.xlane.xlu1 %230  ;;  %v157_v52 = vpop.xlane.xlu2 %156 }
  0xa4   :  { %v154_v51 = vpop.xlane.xlu0 %153  ;;  %v181_v2 = vperm.slane %v157_v52, %v176_v53  ;;  %v255_v8 = vperm.slane %v231_v50, %v176_v53 }
  0xa5   :  { %v180_v62 = vperm.slane %v154_v51, %v176_v53 }
  0xa6   :  { %v262_v20 = vsel %vm189_vm4, %v255_v8, %v261_v18 }
  0xa7   :  { %v190_v3 = vsel %vm189_vm4, %v180_v62, %v188_v1 }
  0xa8   :  { %v192_v9 = vsel %vm191_vm5, %v181_v2, %v190_v3 }
  0xab   :  { %v160_v59 = vpop.xlane.xlu1 %159  ;;  %v237_v60 = vpop.xlane.xlu2 %236 }
  0xac   :  { %v234_v56 = vpop.xlane.xlu0 %233  ;;  %v182_v4 = vperm.slane %v160_v59, %v176_v53  ;;  %v257_v21 = vperm.slane %v237_v60, %v176_v53 }
  0xad   :  { %v256_v13 = vperm.slane %v234_v56, %v176_v53 }
  0xae   :  { %v194_v12 = vsel %vm193_vm6, %v182_v4, %v192_v9 }
  0xaf   :  { %v263_v23 = vsel %vm191_vm5, %v256_v13, %v262_v20 }
  0xb0   :  { %v264_v26 = vsel %vm193_vm6, %v257_v21, %v263_v23 }
  0xb3   :  { %v166_v11 = vpop.xlane.xlu2 %165  ;;  %v240_v16 = vpop.xlane.xlu1 %239 }
  0xb4   :  { %v163_v6 = vpop.xlane.xlu0 %162  ;;  %v184_v15 = vperm.slane %v166_v11, %v176_v53  ;;  %v258_v24 = vperm.slane %v240_v16, %v176_v53 }
  0xb5   :  { %v183_v10 = vperm.slane %v163_v6, %v176_v53 }
  0xb6   :  { %v265_v29 = vsel %vm195_vm7, %v258_v24, %v264_v26 }
  0xb7   :  { %v196_v17 = vsel %vm195_vm7, %v183_v10, %v194_v12 }
  0xb8   :  { %v198_v19 = vsel %vm197_vm8, %v184_v15, %v196_v17 }
  0xb9   :  { %v200_v22 = vadd.f32 %v198_v19, %v125_v14 }
  0xbb   :  { %202 = vst.msk [vmem:[#allocation2] sm:$0xff] %vm122_vm1, %v200_v22 }
  0xbc   :  { %v243_v25 = vpop.xlane.xlu0 %242 }
  0xbd   :  { %v259_v28 = vperm.slane %v243_v25, %v176_v53 }
  0xbf   :  { %v266_v30 = vsel %vm197_vm8, %v259_v28, %v265_v29 }
  0xc0   :  { %v268_v31 = vadd.f32 %v266_v30, %v203_v27 }
  0xc2   :  { %269 = vst.msk [vmem:[#allocation3] sm:$0xff] %vm122_vm1, %v268_v31  ;;  %v273_v32 = vld [vmem:[#allocation2] sm:$0xff] }
  0xc3   :  { %412 = vmatmul.msk.f32.vlgmr.msra.gmra.mxu1 %vm122_vm1, %v273_v32 }
  0xc9   :  { %v274_v33 = vld [vmem:[#allocation3] sm:$0xff] }
  0xca   :  { %v275_v34 = vsub.f32 %v273_v32, %v274_v33  ;;  %411 = vmatmul.msk.f32.vlgmr.msra.gmra.mxu0 %vm122_vm1, %v274_v33 }
  0xcc   :  { %v276_v35 = vand.u32 2147483647, %v275_v34 }
  0xce   :  { %413 = vmatmul.msk.f32.vlgmr.msra.gmra.mxu2 %vm122_vm1, %v276_v35 }
 0x140   :  { %v322_v39 = vpop.f32.mrf.mxu1 }
 0x147   :  { %v299_v38 = vpop.f32.mrf.mxu0 }
 0x148   :  { %v323_v40 = vadd.f32 %v322_v39, %v299_v38 }
 0x151   :  { %v346_v42 = vpop.f32.mrf.mxu2 }
 0x152   :  { %v349_v43 = vadd.f32 %v346_v42, %v323_v40 }
 0x154   :  { %v354_v44 = vadd.f32 %v466_v41, %v349_v43 }
 0x156   :  { %v355_v45 = vmax.f32 %v354_v44, 0.0 }
 0x158   :  { %415 = vmatmul.msk.f32.vlgmr.msra.gmra.mxu3 %vm362_vm10, %v355_v45 }
 0x1db   :  { %v387_v47 = vpop.f32.mrf.mxu3 }
 0x1dc   :  { %v388_v48 = vadd.f32 %v467_v46, %v387_v47 }
 0x1de   :  { %390 = vst [vmem:[#allocation15] sm:$0xff] %v388_v48 }
 0x1df   :  { %401 = dma.vmem_to_hbm [thread:$0]  %s397_s16, 128, %s399_s19, [#allocation6]  }
 0x1e0   :  { %644 = dma.done.wait [#allocation6], 128  }
 0x1e1   :  { %645 = vsyncadd [#allocation6], 4294967168 }
 0x1e2   :  { %406 = vsyncpa [#allocation5], 1 }
 0x1e3   :  { %407 = vsyncpa [#allocation8], 1 }
 0x1e4   :  { %408 = vsyncpa [#allocation11], 1 }
 0x1e5   :  { %409 = vsyncpa [#allocation14], 1 }
 0x1e6   :  { %410 = vsyncpa [#allocation6], 1 }

// kernel: tpu_custom_call.1
= control target key start
LH: loop header
LB: loop body
LE: loop exit
PB: predicated region body
PF: predicated region fallthrough
CT: control target
= control target key end

     0   :  { %13 = vsyncpa [#allocation5], 0  ;;  %s767_s0 = inlined_call_operand.hbm [shape: bf16[8,8,32], index: 0, kind: input, shape index: {}]   ;;  %s768_s1 = inlined_call_operand.hbm [shape: bf16[8,8,32], index: 1, kind: input, shape index: {}]   ;;  %s769_s2 = inlined_call_operand.hbm [shape: f32[8,12], index: 2, kind: input, shape index: {}]   ;;  %s770_s3 = inlined_call_operand.hbm [shape: f32[8,12], index: 3, kind: input, shape index: {}]   ;;  %s771_s4 = inlined_call_operand.hbm [shape: f32[8,12], index: 4, kind: input, shape index: {}]   ;;  %s772_s5 = inlined_call_operand.vmem [shape: f32[1,12], index: 5, kind: input, shape index: {}]   ;;  %s773_s6 = inlined_call_operand.hbm [shape: f32[12,128], index: 6, kind: input, shape index: {}]   ;;  %s774_s7 = inlined_call_operand.vmem [shape: f32[1,128], index: 7, kind: input, shape index: {}]   ;;  %s775_s8 = inlined_call_operand.hbm [shape: f32[8,128], index: 8, kind: output, shape index: {}]  }
   0x1   :  { %14 = vsyncpa [#allocation8], 0 }
   0x2   :  { %15 = vsyncpa [#allocation11], 0 }
   0x3   :  { %16 = vsyncpa [#allocation14], 0 }
   0x4   :  { %17 = vsyncpa [#allocation6], 0  ;;  %s35_s29 = sshll.u32 %s768_s1, 4  ;;  %s646_s30 = smov [#allocation7]   ;;  %s36_s29 = int_to_ptr.hbm [resolvable:$true] %s35_s29 }
   0x5   :  { %s37_s9 = sshll.u32 %s646_s30, 4  ;;  %s60_s12 = sshll.u32 %s770_s3, 4  ;;  %s38_s9 = int_to_ptr.vmem [resolvable:$true] %s37_s9  ;;  %s61_s12 = int_to_ptr.hbm [resolvable:$true] %s60_s12 }
   0x6   :  { %s647_s13 = smov 64   ;;  %s648_s14 = smov 4  }
   0x7   :  { %43 = dma.hbm_to_vmem [thread:$0]  %s36_s29, 512, %s38_s9, [#allocation8], %s647_s13, %s647_s13, %s648_s14  }
   0x8   :  { %s649_s15 = smov [#allocation10]   ;;  %s22_s19 = sshll.u32 %s767_s0, 4  ;;  %s23_s19 = int_to_ptr.hbm [resolvable:$true] %s22_s19 }
   0x9   :  { %s62_s16 = sshll.u32 %s649_s15, 4  ;;  %s49_s21 = sshll.u32 %s769_s2, 4  ;;  %s63_s16 = int_to_ptr.vmem [resolvable:$true] %s62_s16  ;;  %s50_s21 = int_to_ptr.hbm [resolvable:$true] %s49_s21 }
   0xa   :  { %65 = dma.hbm_to_vmem [thread:$0]  %s61_s12, 128, %s63_s16, [#allocation11]  }
   0xb   :  { %s650_s22 = smov [#allocation4]   ;;  %s651_s3 = smov [#allocation9]  }
   0xc   :  { %s24_s23 = sshll.u32 %s650_s22, 4  ;;  %s51_s24 = sshll.u32 %s651_s3, 4  ;;  %s25_s23 = int_to_ptr.vmem [resolvable:$true] %s24_s23  ;;  %s52_s24 = int_to_ptr.vmem [resolvable:$true] %s51_s24 }
   0xd   :  { %30 = dma.hbm_to_vmem [thread:$0]  %s23_s19, 512, %s25_s23, [#allocation5], %s647_s13, %s647_s13, %s648_s14  }
   0xe   :  { %s71_s27 = sshll.u32 %s771_s4, 4  ;;  %s83_s29 = sshll.u32 %s773_s6, 4  ;;  %s72_s27 = int_to_ptr.hbm [resolvable:$true] %s71_s27  ;;  %s84_s29 = int_to_ptr.hbm [resolvable:$true] %s83_s29 }
   0xf   :  { %54 = dma.hbm_to_vmem [thread:$0]  %s50_s21, 128, %s52_s24, [#allocation8]  }
  0x10   :  { %s652_s30 = smov [#allocation12]   ;;  %s653_s9 = smov [#allocation13]  }
  0x11   :  { %s73_s2 = sshll.u32 %s652_s30, 4  ;;  %s85_s10 = sshll.u32 %s653_s9, 4  ;;  %s74_s2 = int_to_ptr.vmem [resolvable:$true] %s73_s2  ;;  %s86_s10 = int_to_ptr.vmem [resolvable:$true] %s85_s10 }
  0x12   :  { %76 = dma.hbm_to_vmem [thread:$0]  %s72_s27, 128, %s74_s2, [#allocation11]  }
  0x13   :  { %s654_s11 = smov 128   ;;  %s655_s12 = smov 8  }
  0x14   :  { %91 = dma.hbm_to_vmem [thread:$0]  %s84_s29, 256, %s86_s10, [#allocation14], %s654_s11, %s654_s11, %s655_s12  }
  0x15   :  { %636 = dma.done.wait [#allocation5], 512  }
  0x16   :  { %637 = vsyncadd [#allocation5], 4294966784 }
  0x17   :  { %638 = dma.done.wait [#allocation8], 640  }
  0x18   :  { %639 = vsyncadd [#allocation8], 4294966656 }
  0x19   :  { %640 = dma.done.wait [#allocation11], 256  }
  0x1a   :  { %641 = vsyncadd [#allocation11], 4294967040 }
  0x1b   :  { %642 = dma.done.wait [#allocation14], 256  }
  0x1c   :  { %643 = vsyncadd [#allocation14], 4294967040  ;;  %vm142_vm0 = vcmask 261120   ;;  %v433_v0 = vld [vmem:[#allocation7] sm:$0xff]   ;;  %v448_v2 = vld [vmem:[#allocation4 + $0x8] sm:$0xff]   ;;  %vm122_vm1 = vcmask 64512   ;;  %v175_v49 = vlaneseq }
  0x1d   :  { %v417_v1 = vld [vmem:[#allocation4] sm:$0xff]   ;;  %v434_v3 = vunpack.c.l.bf16 %v433_v0  ;;  %v422_v5 = vunpack.c.l.bf16 %v448_v2  ;;  %v451_v9 = vld [vmem:[#allocation7 + $0x8] sm:$0xff]   ;;  %v435_v10 = vunpack.c.h.bf16 %v433_v0  ;;  %v449_v16 = vld [vmem:[#allocation4 + $0x10] sm:$0xff]   ;;  %v423_v18 = vunpack.c.h.bf16 %v448_v2  ;;  %s657_s15 = smov [#allocation15]   ;;  %s398_s19 = sshll.u32 %s775_s8, 4  ;;  %s399_s19 = int_to_ptr.hbm [resolvable:$true] %s398_s19 }
  0x1e   :  { %v418_v4 = vunpack.c.l.bf16 %v417_v1  ;;  %v419_v11 = vunpack.c.h.bf16 %v417_v1  ;;  %v438_v12 = vunpack.c.l.bf16 %v451_v9  ;;  %v439_v17 = vunpack.c.h.bf16 %v451_v9  ;;  %v452_v23 = vld [vmem:[#allocation7 + $0x10] sm:$0xff]   ;;  %v453_v30 = vld [vmem:[#allocation7 + $0x18] sm:$0xff]   ;;  %v277_v47 = vld [vmem:[#allocation9] sm:$0xff]  ;;  %s396_s16 = sshll.u32 %s657_s15, 4  ;;  %s397_s16 = int_to_ptr.vmem [resolvable:$true] %s396_s16 }
  0x1f   :  { %v220_v6 = vsel %vm142_vm0, %v434_v3, 0.0  ;;  %v149_v8 = vsel %vm142_vm0, %v422_v5, 0.0  ;;  %v223_v13 = vsel %vm142_vm0, %v435_v10, 0.0  ;;  %v426_v19 = vunpack.c.l.bf16 %v449_v16  ;;  %v450_v31 = vld [vmem:[#allocation4 + $0x18] sm:$0xff]   ;;  %320 = vmatpush.msra.mxu1 %v277_v47  ;;  %v278_v48 = vld [vmem:[#allocation10] sm:$0xff]  ;;  %v325_v57 = vld [vmem:[#allocation12] sm:$0xff] }
  0x20   :  { %v143_v7 = vsel %vm142_vm0, %v418_v4, 0.0  ;;  %221 = vadd.xlane.f32.xlu1 %v220_v6  ;;  %150 = vadd.xlane.f32.xlu2 %v149_v8  ;;  %v146_v14 = vsel %vm142_vm0, %v419_v11, 0.0  ;;  %v226_v15 = vsel %vm142_vm0, %v438_v12, 0.0  ;;  %v229_v20 = vsel %vm142_vm0, %v439_v17, 0.0 }
  0x21   :  { %144 = vadd.xlane.f32.xlu0 %v143_v7  ;;  %v152_v21 = vsel %vm142_vm0, %v423_v18, 0.0  ;;  %v155_v22 = vsel %vm142_vm0, %v426_v19, 0.0  ;;  %v427_v24 = vunpack.c.h.bf16 %v449_v16  ;;  %v442_v25 = vunpack.c.l.bf16 %v452_v23  ;;  %297 = vmatpush.msra.mxu0 %v278_v48 }
  0x22   :  { %v443_v26 = vunpack.c.h.bf16 %v452_v23  ;;  %v446_v32 = vunpack.c.l.bf16 %v453_v30  ;;  %v430_v33 = vunpack.c.l.bf16 %v450_v31  ;;  %v431_v34 = vunpack.c.h.bf16 %v450_v31  ;;  %344 = vmatpush.msra.mxu2 %v325_v57 }
  0x23   :  { %v158_v27 = vsel %vm142_vm0, %v427_v24, 0.0  ;;  %v232_v28 = vsel %vm142_vm0, %v442_v25, 0.0  ;;  %v447_v38 = vunpack.c.h.bf16 %v453_v30  ;;  %v656_v40 = vmov 0.0  }
  0x24   :  { %v235_v29 = vsel %vm142_vm0, %v443_v26, 0.0  ;;  %v238_v35 = vsel %vm142_vm0, %v446_v32, 0.0  ;;  %v161_v36 = vsel %vm142_vm0, %v430_v33, 0.0  ;;  %v164_v37 = vsel %vm142_vm0, %v431_v34, 0.0  ;;  %123 = vst.msk [vmem:[#allocation2] sm:$0xff] %vm122_vm1, %v656_v40 }
  0x25   :  { %v241_v39 = vsel %vm142_vm0, %v447_v38, 0.0  ;;  %124 = vst.msk [vmem:[#allocation3] sm:$0xff] %vm122_vm1, %v656_v40  ;;  %v176_v53 = vand.u32 127, %v175_v49  ;;  %vm185_vm2 = vcmask 1041409   ;;  %vm187_vm3 = vcmask 1042434  }
  0x26   :  { %vm189_vm4 = vcmask 1043459   ;;  %vm191_vm5 = vcmask 1044484   ;;  %vm193_vm6 = vcmask 1045509   ;;  %vm195_vm7 = vcmask 1046534  }
  0x27   :  { %vm197_vm8 = vcmask 1047559   ;;  %vm366_vm9 = vcmask 1043456   ;;  %vm362_vm10 = vcmask 97280  }
  0x28   :  { %224 = vadd.xlane.f32.xlu1 %v223_v13  ;;  %227 = vadd.xlane.f32.xlu2 %v226_v15 }
  0x29   :  { %147 = vadd.xlane.f32.xlu0 %v146_v14 }
  0x2b   :  { %v125_v14 = vld [vmem:[#allocation2] sm:$0xff] }
  0x30   :  { %230 = vadd.xlane.f32.xlu1 %v229_v20  ;;  %156 = vadd.xlane.f32.xlu2 %v155_v22 }
  0x31   :  { %153 = vadd.xlane.f32.xlu0 %v152_v21 }
  0x38   :  { %159 = vadd.xlane.f32.xlu1 %v158_v27  ;;  %236 = vadd.xlane.f32.xlu2 %v235_v29  ;;  %v203_v27 = vld [vmem:[#allocation3] sm:$0xff] }
  0x39   :  { %233 = vadd.xlane.f32.xlu0 %v232_v28 }
  0x40   :  { %239 = vadd.xlane.f32.xlu1 %v238_v35  ;;  %165 = vadd.xlane.f32.xlu2 %v164_v37  ;;  %v356_v37 = vld [vmem:[#allocation13] sm:$0xff] }
  0x41   :  { %162 = vadd.xlane.f32.xlu0 %v161_v36  ;;  %v357_v36 = vld [vmem:[#allocation13 + $0x8] sm:$0xf] }
  0x42   :  { %414 = vmatpush.msk.msra.mxu3 %vm366_vm9, %v357_v36 }
  0x44   :  { %385 = vmatpush.msra.mxu3 %v356_v37 }
  0x49   :  { %242 = vadd.xlane.f32.xlu0 %v241_v39 }
  0x93   :  { %v222_v41 = vpop.xlane.xlu1 %221  ;;  %v151_v43 = vpop.xlane.xlu2 %150 }
  0x94   :  { %v145_v42 = vpop.xlane.xlu0 %144  ;;  %v179_v58 = vperm.slane %v151_v43, %v176_v53  ;;  %v252_v63 = vperm.slane %v222_v41, %v176_v53  ;;  %v466_v41 = vld [vmem:[%s772_s5] ss:$0 sm:$0xff] }
  0x95   :  { %v177_v55 = vperm.slane %v145_v42, %v176_v53 }
  0x9b   :  { %v225_v44 = vpop.xlane.xlu1 %224  ;;  %v228_v46 = vpop.xlane.xlu2 %227 }
  0x9c   :  { %v148_v45 = vpop.xlane.xlu0 %147  ;;  %v253_v0 = vperm.slane %v225_v44, %v176_v53  ;;  %v254_v5 = vperm.slane %v228_v46, %v176_v53  ;;  %v467_v46 = vld [vmem:[%s774_s7] ss:$0 sm:$0xff] }
  0x9d   :  { %v178_v54 = vperm.slane %v148_v45, %v176_v53 }
  0x9e   :  { %v260_v7 = vsel %vm185_vm2, %v253_v0, %v252_v63 }
  0x9f   :  { %v186_v61 = vsel %vm185_vm2, %v178_v54, %v177_v55  ;;  %v261_v18 = vsel %vm187_vm3, %v254_v5, %v260_v7 }
  0xa0   :  { %v188_v1 = vsel %vm187_vm3, %v179_v58, %v186_v61 }
  0xa3   :  { %v231_v50 = vpop.xlane.xlu1 %230  ;;  %v157_v52 = vpop.xlane.xlu2 %156 }
  0xa4   :  { %v154_v51 = vpop.xlane.xlu0 %153  ;;  %v181_v2 = vperm.slane %v157_v52, %v176_v53  ;;  %v255_v8 = vperm.slane %v231_v50, %v176_v53 }
  0xa5   :  { %v180_v62 = vperm.slane %v154_v51, %v176_v53 }
  0xa6   :  { %v262_v20 = vsel %vm189_vm4, %v255_v8, %v261_v18 }
  0xa7   :  { %v190_v3 = vsel %vm189_vm4, %v180_v62, %v188_v1 }
  0xa8   :  { %v192_v9 = vsel %vm191_vm5, %v181_v2, %v190_v3 }
  0xab   :  { %v160_v59 = vpop.xlane.xlu1 %159  ;;  %v237_v60 = vpop.xlane.xlu2 %236 }
  0xac   :  { %v234_v56 = vpop.xlane.xlu0 %233  ;;  %v182_v4 = vperm.slane %v160_v59, %v176_v53  ;;  %v257_v21 = vperm.slane %v237_v60, %v176_v53 }
  0xad   :  { %v256_v13 = vperm.slane %v234_v56, %v176_v53 }
  0xae   :  { %v194_v12 = vsel %vm193_vm6, %v182_v4, %v192_v9 }
  0xaf   :  { %v263_v23 = vsel %vm191_vm5, %v256_v13, %v262_v20 }
  0xb0   :  { %v264_v26 = vsel %vm193_vm6, %v257_v21, %v263_v23 }
  0xb3   :  { %v166_v11 = vpop.xlane.xlu2 %165  ;;  %v240_v16 = vpop.xlane.xlu1 %239 }
  0xb4   :  { %v163_v6 = vpop.xlane.xlu0 %162  ;;  %v184_v15 = vperm.slane %v166_v11, %v176_v53  ;;  %v258_v24 = vperm.slane %v240_v16, %v176_v53 }
  0xb5   :  { %v183_v10 = vperm.slane %v163_v6, %v176_v53 }
  0xb6   :  { %v265_v29 = vsel %vm195_vm7, %v258_v24, %v264_v26 }
  0xb7   :  { %v196_v17 = vsel %vm195_vm7, %v183_v10, %v194_v12 }
  0xb8   :  { %v198_v19 = vsel %vm197_vm8, %v184_v15, %v196_v17 }
  0xb9   :  { %v200_v22 = vadd.f32 %v198_v19, %v125_v14 }
  0xbb   :  { %202 = vst.msk [vmem:[#allocation2] sm:$0xff] %vm122_vm1, %v200_v22 }
  0xbc   :  { %v243_v25 = vpop.xlane.xlu0 %242 }
  0xbd   :  { %v259_v28 = vperm.slane %v243_v25, %v176_v53 }
  0xbf   :  { %v266_v30 = vsel %vm197_vm8, %v259_v28, %v265_v29 }
  0xc0   :  { %v268_v31 = vadd.f32 %v266_v30, %v203_v27 }
  0xc2   :  { %269 = vst.msk [vmem:[#allocation3] sm:$0xff] %vm122_vm1, %v268_v31  ;;  %v273_v32 = vld [vmem:[#allocation2] sm:$0xff] }
  0xc3   :  { %412 = vmatmul.msk.f32.vlgmr.msra.gmra.mxu1 %vm122_vm1, %v273_v32 }
  0xc9   :  { %v274_v33 = vld [vmem:[#allocation3] sm:$0xff] }
  0xca   :  { %v275_v34 = vsub.f32 %v273_v32, %v274_v33  ;;  %411 = vmatmul.msk.f32.vlgmr.msra.gmra.mxu0 %vm122_vm1, %v274_v33 }
  0xcc   :  { %v276_v35 = vand.u32 2147483647, %v275_v34 }
  0xce   :  { %413 = vmatmul.msk.f32.vlgmr.msra.gmra.mxu2 %vm122_vm1, %v276_v35 }
 0x140   :  { %v322_v39 = vpop.f32.mrf.mxu1 }
 0x147   :  { %v299_v38 = vpop.f32.mrf.mxu0 }
 0x148   :  { %v323_v40 = vadd.f32 %v322_v39, %v299_v38 }
 0x151   :  { %v346_v42 = vpop.f32.mrf.mxu2 }
 0x152   :  { %v349_v43 = vadd.f32 %v346_v42, %v323_v40 }
 0x154   :  { %v354_v44 = vadd.f32 %v466_v41, %v349_v43 }
 0x156   :  { %v355_v45 = vmax.f32 %v354_v44, 0.0 }
 0x158   :  { %415 = vmatmul.msk.f32.vlgmr.msra.gmra.mxu3 %vm362_vm10, %v355_v45 }
 0x1db   :  { %v387_v47 = vpop.f32.mrf.mxu3 }
 0x1dc   :  { %v388_v48 = vadd.f32 %v467_v46, %v387_v47 }
 0x1de   :  { %390 = vst [vmem:[#allocation15] sm:$0xff] %v388_v48 }
 0x1df   :  { %401 = dma.vmem_to_hbm [thread:$0]  %s397_s16, 128, %s399_s19, [#allocation6]  }
 0x1e0   :  { %644 = dma.done.wait [#allocation6], 128  }
 0x1e1   :  { %645 = vsyncadd [#allocation6], 4294967168 }
 0x1e2   :  { %406 = vsyncpa [#allocation5], 1 }
 0x1e3   :  { %407 = vsyncpa [#allocation8], 1 }
 0x1e4   :  { %408 = vsyncpa [#allocation11], 1 }
 0x1e5   :  { %409 = vsyncpa [#allocation14], 1 }
 0x1e6   :  { %410 = vsyncpa [#allocation6], 1 }

</bundles_post_ra>
